<compile_context>
chip_gen: v7x
topology: tpu7x:2x2x1
jax: 0.10.0
libtpu: 0.0.40
codegen_flags: <defaults>
</compile_context>

<pallas_src>
import jax
import jax.numpy as jnp
from jax.experimental import pallas as pl
from jax.experimental.pallas import tpu as pltpu


def _sigmoid(x):
    # tanh form: one EUP push per element (vs exp + reciprocal = two).
    return 0.5 * (jnp.tanh(0.5 * x) + 1.0)


def _mlp_kernel(x_ref, w1_ref, b1_ref, w2_ref, b2_ref, w3_ref, b3_ref, o_ref):
    # Lane-dense layout: x_ref (13, TN) bf16, w* (out, in) bf16, b* (out, 1) f32,
    # o_ref (15, TN) f32. All elementwise work and stores are full 128-lane width.
    x = x_ref[...]
    z1 = jnp.dot(w1_ref[...], x, preferred_element_type=jnp.float32) + b1_ref[...]
    h1 = _sigmoid(z1)                                          # (50, TN) f32
    z2 = jnp.dot(w2_ref[...], h1.astype(jnp.bfloat16),
                 preferred_element_type=jnp.float32) + b2_ref[...]
    h2 = _sigmoid(z2)                                          # (30, TN) f32
    z3 = jnp.dot(w3_ref[...], h2.astype(jnp.bfloat16),
                 preferred_element_type=jnp.float32) + b3_ref[...]
    o_ref[...] = _sigmoid(z3)                                  # (15, TN) f32


def _round_up(v, m):
    return ((v + m - 1) // m) * m


def my_model_forward(x, params, *, block_cols=4096):
    """Pallas implementation of myModel.forward.

    x: any shape whose elements flatten to (-1, 13).
    params: dict with torch-layout weights: w1 (50,13), b1 (50,1), w2 (30,50),
            b2 (30,1), w3 (15,30), b3 (15,1).
    block_cols: batch-lane tile size (rounded to a multiple of 128).
    Returns (N, 15) float32.
    """
    x2d = x.reshape(-1, 13)
    n = x2d.shape[0]

    # Lane tile: multiple of 128; cap so a large default still yields >=2 grid
    # steps when the batch is big enough (v7x megacore sharding of the grid).
    tn = max(128, (int(block_cols) // 128) * 128)
    tn = min(tn, max(128, _round_up(-(-n // 2), 128)))
    n_pad = _round_up(n, tn)

    # Batch-on-lanes layout, bf16 for the MXU (halves HBM read of x).
    x_t = x2d.T.astype(jnp.bfloat16)                      # (13, n)
    if n_pad != n:
        x_t = jnp.pad(x_t, ((0, 0), (0, n_pad - n)))      # (13, n_pad)

    w1 = params["w1"].astype(jnp.bfloat16)
    w2 = params["w2"].astype(jnp.bfloat16)
    w3 = params["w3"].astype(jnp.bfloat16)
    b1 = params["b1"].astype(jnp.float32)
    b2 = params["b2"].astype(jnp.float32)
    b3 = params["b3"].astype(jnp.float32)

    resident = lambda shape: pl.BlockSpec(shape, lambda i: (0, 0))

    out_t = pl.pallas_call(
        _mlp_kernel,
        out_shape=jax.ShapeDtypeStruct((15, n_pad), jnp.float32),
        grid=(n_pad // tn,),
        in_specs=[
            pl.BlockSpec((13, tn), lambda i: (0, i)),     # streamed batch tiles
            resident((50, 13)),
            resident((50, 1)),
            resident((30, 50)),
            resident((30, 1)),
            resident((15, 30)),
            resident((15, 1)),
        ],
        out_specs=pl.BlockSpec((15, tn), lambda i: (0, i)),
        compiler_params=pltpu.CompilerParams(
            dimension_semantics=("parallel",),
        ),
    )(x_t, w1, b1, w2, b2, w3, b3)

    # Back to torch layout (n, 15); under jit the slice + transpose fuse.
    return out_t[:, :n].T


def init_params(key):
    """Deterministic init mimicking nn.Linear's U(-1/sqrt(fan_in), 1/sqrt(fan_in)).

    Weights in torch layout (out_features, in_features); biases (out_features, 1).
    """
    dims = [(13, 50), (50, 30), (30, 15)]
    params = {}
    for i, (fan_in, fan_out) in enumerate(dims, start=1):
        key, kw, kb = jax.random.split(key, 3)
        bound = 1.0 / jnp.sqrt(float(fan_in))
        params[f"w{i}"] = jax.random.uniform(
            kw, (fan_out, fan_in), jnp.float32, minval=-bound, maxval=bound
        )
        params[f"b{i}"] = jax.random.uniform(
            kb, (fan_out, 1), jnp.float32, minval=-bound, maxval=bound
        )
    return params


def _ref(x, p):
    # Pure-JAX f32 reference identical to the torch module.
    x = x.reshape(-1, 13).astype(jnp.float32)
    h1 = jax.nn.sigmoid(x @ p["w1"].T + p["b1"][:, 0])
    h2 = jax.nn.sigmoid(h1 @ p["w2"].T + p["b2"][:, 0])
    return jax.nn.sigmoid(h2 @ p["w3"].T + p["b3"][:, 0])


if __name__ == "__main__":
    key = jax.random.PRNGKey(0)
    k_params, k_x1, k_x2 = jax.random.split(key, 3)

    params = init_params(k_params)
    fwd = jax.jit(my_model_forward, static_argnames=("block_cols",))

    # Higher-rank input (exercises x.view(-1, 13)); single tile.
    x_small = jax.random.normal(k_x1, (2, 4, 13), dtype=jnp.float32)
    y_small = fwd(x_small, params)
    jax.block_until_ready(y_small)
    assert y_small.shape == (8, 15)
    # bf16 matmul inputs -> loosened tolerance vs the f32 reference.
    assert jnp.allclose(y_small, _ref(x_small, params), atol=2e-2, rtol=2e-2)

    # Larger ragged batch with multiple grid steps (tiling + padding + slice).
    x_multi = jax.random.normal(k_x2, (300, 13), dtype=jnp.float32)
    y_multi = fwd(x_multi, params, block_cols=128)
    jax.block_until_ready(y_multi)
    assert y_multi.shape == (300, 15)
    assert jnp.allclose(y_multi, _ref(x_multi, params), atol=2e-2, rtol=2e-2)

    print("KERNEL_OK")
</pallas_src>

<mosaic_0001>
module attributes {stable_mosaic.version = 11 : i64} {
  func.func @_mlp_kernel(%arg0: i32, %arg1: memref<13x128xbf16, #tpu.memory_space<vmem>>, %arg2: memref<50x13xbf16, #tpu.memory_space<vmem>>, %arg3: memref<50x1xf32, #tpu.memory_space<vmem>>, %arg4: memref<30x50xbf16, #tpu.memory_space<vmem>>, %arg5: memref<30x1xf32, #tpu.memory_space<vmem>>, %arg6: memref<15x30xbf16, #tpu.memory_space<vmem>>, %arg7: memref<15x1xf32, #tpu.memory_space<vmem>>, %arg8: memref<15x128xf32, #tpu.memory_space<vmem>>) attributes {dimension_semantics = [#tpu.dimension_semantics<parallel>], iteration_bounds = array<i64: 1>, scalar_prefetch = 0 : i64, scratch_operands = 0 : i64, tpu.core_type = #tpu.core_type<tc>, window_params = [{transform_indices = @transform_0, window_bounds = array<i64: 13, 128>}, {pipeline_mode = #tpu.pipeline_mode<synchronous>, transform_indices = @transform_1, window_bounds = array<i64: 50, 13>}, {pipeline_mode = #tpu.pipeline_mode<synchronous>, transform_indices = @transform_2, window_bounds = array<i64: 50, 1>}, {pipeline_mode = #tpu.pipeline_mode<synchronous>, transform_indices = @transform_3, window_bounds = array<i64: 30, 50>}, {pipeline_mode = #tpu.pipeline_mode<synchronous>, transform_indices = @transform_4, window_bounds = array<i64: 30, 1>}, {pipeline_mode = #tpu.pipeline_mode<synchronous>, transform_indices = @transform_5, window_bounds = array<i64: 15, 30>}, {pipeline_mode = #tpu.pipeline_mode<synchronous>, transform_indices = @transform_6, window_bounds = array<i64: 15, 1>}, {transform_indices = @transform_7, window_bounds = array<i64: 15, 128>}]} {
    %c0 = arith.constant 0 : index
    %c0_0 = arith.constant 0 : index
    %0 = vector.load %arg1[%c0, %c0_0] : memref<13x128xbf16, #tpu.memory_space<vmem>>, vector<13x128xbf16>
    %c0_1 = arith.constant 0 : index
    %c0_2 = arith.constant 0 : index
    %1 = vector.load %arg2[%c0_1, %c0_2] : memref<50x13xbf16, #tpu.memory_space<vmem>>, vector<50x13xbf16>
    %cst = arith.constant dense<0.000000e+00> : vector<50x128xf32>
    %2 = tpu.matmul %1, %0, %cst {dimension_numbers = #tpu.dot_dimension_numbers<[1], [0], [0], [1], [0, 0, 1, 1], [], []>} : vector<50x13xbf16>, vector<13x128xbf16>, vector<50x128xf32> -> vector<50x128xf32>
    %c0_3 = arith.constant 0 : index
    %c0_4 = arith.constant 0 : index
    %3 = vector.load %arg3[%c0_3, %c0_4] : memref<50x1xf32, #tpu.memory_space<vmem>>, vector<50x1xf32>
    %4 = vector.broadcast %3 : vector<50x1xf32> to vector<50x128xf32>
    %5 = arith.addf %2, %4 : vector<50x128xf32>
    %cst_5 = arith.constant 5.000000e-01 : f32
    %6 = vector.broadcast %cst_5 : f32 to vector<50x128xf32>
    %7 = arith.mulf %6, %5 : vector<50x128xf32>
    %8 = math.tanh %7 : vector<50x128xf32>
    %cst_6 = arith.constant 1.000000e+00 : f32
    %9 = vector.broadcast %cst_6 : f32 to vector<50x128xf32>
    %10 = arith.addf %8, %9 : vector<50x128xf32>
    %cst_7 = arith.constant 5.000000e-01 : f32
    %11 = vector.broadcast %cst_7 : f32 to vector<50x128xf32>
    %12 = arith.mulf %11, %10 : vector<50x128xf32>
    %c0_8 = arith.constant 0 : index
    %c0_9 = arith.constant 0 : index
    %13 = vector.load %arg4[%c0_8, %c0_9] : memref<30x50xbf16, #tpu.memory_space<vmem>>, vector<30x50xbf16>
    %14 = arith.truncf %12 : vector<50x128xf32> to vector<50x128xbf16>
    %cst_10 = arith.constant dense<0.000000e+00> : vector<30x128xf32>
    %15 = tpu.matmul %13, %14, %cst_10 {dimension_numbers = #tpu.dot_dimension_numbers<[1], [0], [0], [1], [0, 0, 1, 1], [], []>} : vector<30x50xbf16>, vector<50x128xbf16>, vector<30x128xf32> -> vector<30x128xf32>
    %c0_11 = arith.constant 0 : index
    %c0_12 = arith.constant 0 : index
    %16 = vector.load %arg5[%c0_11, %c0_12] : memref<30x1xf32, #tpu.memory_space<vmem>>, vector<30x1xf32>
    %17 = vector.broadcast %16 : vector<30x1xf32> to vector<30x128xf32>
    %18 = arith.addf %15, %17 : vector<30x128xf32>
    %cst_13 = arith.constant 5.000000e-01 : f32
    %19 = vector.broadcast %cst_13 : f32 to vector<30x128xf32>
    %20 = arith.mulf %19, %18 : vector<30x128xf32>
    %21 = math.tanh %20 : vector<30x128xf32>
    %cst_14 = arith.constant 1.000000e+00 : f32
    %22 = vector.broadcast %cst_14 : f32 to vector<30x128xf32>
    %23 = arith.addf %21, %22 : vector<30x128xf32>
    %cst_15 = arith.constant 5.000000e-01 : f32
    %24 = vector.broadcast %cst_15 : f32 to vector<30x128xf32>
    %25 = arith.mulf %24, %23 : vector<30x128xf32>
    %c0_16 = arith.constant 0 : index
    %c0_17 = arith.constant 0 : index
    %26 = vector.load %arg6[%c0_16, %c0_17] : memref<15x30xbf16, #tpu.memory_space<vmem>>, vector<15x30xbf16>
    %27 = arith.truncf %25 : vector<30x128xf32> to vector<30x128xbf16>
    %cst_18 = arith.constant dense<0.000000e+00> : vector<15x128xf32>
    %28 = tpu.matmul %26, %27, %cst_18 {dimension_numbers = #tpu.dot_dimension_numbers<[1], [0], [0], [1], [0, 0, 1, 1], [], []>} : vector<15x30xbf16>, vector<30x128xbf16>, vector<15x128xf32> -> vector<15x128xf32>
    %c0_19 = arith.constant 0 : index
    %c0_20 = arith.constant 0 : index
    %29 = vector.load %arg7[%c0_19, %c0_20] : memref<15x1xf32, #tpu.memory_space<vmem>>, vector<15x1xf32>
    %30 = vector.broadcast %29 : vector<15x1xf32> to vector<15x128xf32>
    %31 = arith.addf %28, %30 : vector<15x128xf32>
    %cst_21 = arith.constant 5.000000e-01 : f32
    %32 = vector.broadcast %cst_21 : f32 to vector<15x128xf32>
    %33 = arith.mulf %32, %31 : vector<15x128xf32>
    %34 = math.tanh %33 : vector<15x128xf32>
    %cst_22 = arith.constant 1.000000e+00 : f32
    %35 = vector.broadcast %cst_22 : f32 to vector<15x128xf32>
    %36 = arith.addf %34, %35 : vector<15x128xf32>
    %cst_23 = arith.constant 5.000000e-01 : f32
    %37 = vector.broadcast %cst_23 : f32 to vector<15x128xf32>
    %38 = arith.mulf %37, %36 : vector<15x128xf32>
    %c0_24 = arith.constant 0 : index
    %c0_25 = arith.constant 0 : index
    %39 = vector.load %arg8[%c0_24, %c0_25] : memref<15x128xf32, #tpu.memory_space<vmem>>, vector<15x128xf32>
    tpu.vector_store %arg8[%c0_24, %c0_25], %38 {strides = array<i32>} : memref<15x128xf32, #tpu.memory_space<vmem>>, vector<15x128xf32>,
    return
  }
  func.func @transform_0(%arg0: i32) -> (i32, i32) {
    %c0_i32 = arith.constant 0 : i32
    %c0_i32_0 = arith.constant 0 : i32
    return %c0_i32, %arg0 : i32, i32
  }
  func.func @transform_1(%arg0: i32) -> (i32, i32) {
    %c0_i32 = arith.constant 0 : i32
    %c0_i32_0 = arith.constant 0 : i32
    %c0_i32_1 = arith.constant 0 : i32
    return %c0_i32, %c0_i32_0 : i32, i32
  }
  func.func @transform_2(%arg0: i32) -> (i32, i32) {
    %c0_i32 = arith.constant 0 : i32
    %c0_i32_0 = arith.constant 0 : i32
    %c0_i32_1 = arith.constant 0 : i32
    return %c0_i32, %c0_i32_0 : i32, i32
  }
  func.func @transform_3(%arg0: i32) -> (i32, i32) {
    %c0_i32 = arith.constant 0 : i32
    %c0_i32_0 = arith.constant 0 : i32
    %c0_i32_1 = arith.constant 0 : i32
    return %c0_i32, %c0_i32_0 : i32, i32
  }
  func.func @transform_4(%arg0: i32) -> (i32, i32) {
    %c0_i32 = arith.constant 0 : i32
    %c0_i32_0 = arith.constant 0 : i32
    %c0_i32_1 = arith.constant 0 : i32
    return %c0_i32, %c0_i32_0 : i32, i32
  }
  func.func @transform_5(%arg0: i32) -> (i32, i32) {
    %c0_i32 = arith.constant 0 : i32
    %c0_i32_0 = arith.constant 0 : i32
    %c0_i32_1 = arith.constant 0 : i32
    return %c0_i32, %c0_i32_0 : i32, i32
  }
  func.func @transform_6(%arg0: i32) -> (i32, i32) {
    %c0_i32 = arith.constant 0 : i32
    %c0_i32_0 = arith.constant 0 : i32
    %c0_i32_1 = arith.constant 0 : i32
    return %c0_i32, %c0_i32_0 : i32, i32
  }
  func.func @transform_7(%arg0: i32) -> (i32, i32) {
    %c0_i32 = arith.constant 0 : i32
    %c0_i32_0 = arith.constant 0 : i32
    return %c0_i32, %arg0 : i32, i32
  }
}

</mosaic_0001>

<bundles_post_ra>
// kernel: my_model_forward.1
= control target key start
LH: loop header
LB: loop body
LE: loop exit
PB: predicated region body
PF: predicated region fallthrough
CT: control target
= control target key end

     0   :  { %vm114_vm0 = vcmask 1045504   ;;  %vm115_vm1 = vcmask 1046528   ;;  %vm101_vm2 = vcmask 105472   ;;  %v514_v1 = vmov 65535   ;;  %s635_s0 = inlined_call_operand.vmem [shape: bf16[13,128], index: 0, kind: input, shape index: {}]   ;;  %s636_s1 = inlined_call_operand.vmem [shape: bf16[50,13], index: 1, kind: input, shape index: {}]   ;;  %s637_s2 = inlined_call_operand.vmem [shape: f32[50,1], index: 2, kind: input, shape index: {}]   ;;  %s638_s4 = inlined_call_operand.vmem [shape: f32[30,1], index: 4, kind: input, shape index: {}]   ;;  %s639_s6 = inlined_call_operand.vmem [shape: f32[15,1], index: 6, kind: input, shape index: {}]   ;;  %s640_s3 = inlined_call_operand.vmem [shape: bf16[30,50], index: 3, kind: input, shape index: {}]   ;;  %s641_s5 = inlined_call_operand.vmem [shape: bf16[15,30], index: 5, kind: input, shape index: {}]   ;;  %s642_s7 = inlined_call_operand.vmem [shape: f32[15,128], index: 7, kind: output, shape index: {}]  }
   0x1   :  { %v480_v0 = vld [vmem:[%s635_s0] sm:$0x7f]   ;;  %v116_v2 = vsel %vm114_vm0, 4294967295, %v514_v1  ;;  %v515_v6 = vmov 0   ;;  %v482_v8 = vld [vmem:[%s636_s1 + $0x8] sm:$0xff]   ;;  %v38_v9 = vld [vmem:[%s637_s2 + $0x10] sm:$0xff] }
   0x2   :  { %v481_v3 = vld [vmem:[%s636_s1] sm:$0xff]   ;;  %v117_v4 = vsel %vm115_vm1, %v116_v2, 0  ;;  %478 = vset.pattern.permute.xlu0 %v515_v6  ;;  %479 = vset.pattern.permute.xlu1 %v515_v6  ;;  %v483_v10 = vld [vmem:[%s636_s1 + $0x10] sm:$0xff]   ;;  %v37_v11 = vld [vmem:[%s637_s2 + $0x8] sm:$0xff]  ;;  %vm255_vm3 = vcmask 408576   ;;  %vm262_vm4 = vcmask 1040384  }
   0x3   :  { %v119_v5 = vand.u32 %v480_v0, %v117_v4  ;;  %445 = vmatprep.mubr.msk.bf16.mxu0 %vm101_vm2, %v481_v3  ;;  %v36_v7 = vld [vmem:[%s637_s2] sm:$0xff]  ;;  %55 = vperm.xlu1 %479, %v38_v9   ;;  %v39_v12 = vld [vmem:[%s637_s2 + $0x18] sm:$0xff]  ;;  %v41_v14 = vld [vmem:[%s637_s2 + $0x28] sm:$0xff]  ;;  %vm517_vm5 = vmmov 0   ;;  %vm352_vm6 = vcmask 244736  }
   0x4   :  { %45 = vperm.xlu0 %478, %v36_v7   ;;  %v40_v13 = vld [vmem:[%s637_s2 + $0x20] sm:$0xff]  ;;  %v484_v15 = vld [vmem:[%s636_s1 + $0x18] ss:$0 sps:$4 sm:$0x11]   ;;  %v42_v16 = vld [vmem:[%s637_s2 + $0x30] sm:$0x3] }
   0x5   :  { %443 = vmatprep.subr.bf16.mxu0 %v119_v5  ;;  %v221_v17 = vld [vmem:[%s638_s4] sm:$0xff]  ;;  %v222_v18 = vld [vmem:[%s638_s4 + $0x8] sm:$0xff]  ;;  %v223_v19 = vld [vmem:[%s638_s4 + $0x10] sm:$0xff] }
   0x6   :  { %444 = vmatpush3.bf16.msra.mxu0 %v119_v5  ;;  %v224_v20 = vld [vmem:[%s638_s4 + $0x18] sm:$0x3f]  ;;  %v335_v21 = vld [vmem:[%s639_s6] sm:$0xff]  ;;  %v336_v22 = vld [vmem:[%s639_s6 + $0x8] sm:$0x7f] }
   0x7   :  { %60 = vperm.xlu1 %479, %v39_v12   ;;  %v485_v23 = vld [vmem:[%s640_s3] sm:$0xff]  }
   0x8   :  { %50 = vperm.xlu0 %478, %v37_v11   ;;  %461 = vmatprep.mubr.msk.bf16.mxu1 %vm255_vm3, %v485_v23 }
   0x9   :  { %446 = vmatmul.mubr.msk.bf16.vlgmr.msra.gmra.mrb[0].mxu0 %vm101_vm2, %v482_v8 }
   0xa   :  { %449 = vmatprep.mubr.msk.bf16.mxu0 %vm101_vm2, %v483_v10 }
   0xb   :  { %70 = vperm.xlu1 %479, %v41_v14  }
   0xc   :  { %65 = vperm.xlu0 %478, %v40_v13  }
   0xf   :  { %227 = vperm.xlu1 %479, %v221_v17  }
  0x10   :  { %75 = vperm.xlu0 %478, %v42_v16   ;;  %v516_v16 = vmov 0.0  }
  0x11   :  { %450 = vmatmul.mubr.msk.bf16.gmra.mrb[4].mxu0 %vm101_vm2, %v484_v15  ;;  %v486_v15 = vld [vmem:[%s640_s3 + $0x8] sm:$0x7f]   ;;  %465 = vmatprep.subr.bf16.mxu0 %v516_v16 }
  0x12   :  { %469 = vmatprep.mubr.msk.bf16.mxu0 %vm517_vm5, %v516_v16 }
  0x13   :  { %237 = vperm.xlu1 %479, %v223_v19  }
  0x14   :  { %232 = vperm.xlu0 %478, %v222_v18  }
  0x17   :  { %339 = vperm.xlu1 %479, %v335_v21  }
  0x18   :  { %242 = vperm.xlu0 %478, %v224_v20  }
  0x1c   :  { %344 = vperm.xlu0 %478, %v336_v22  }
  0x82   :  { %v56_v25 = vpop.permute.xlu1 %55 }
  0x83   :  { %v46_v24 = vpop.permute.xlu0 %45 }
  0x86   :  { %v61_v28 = vpop.permute.xlu1 %60 }
  0x87   :  { %v51_v26 = vpop.permute.xlu0 %50 }
  0x8a   :  { %v71_v47 = vpop.permute.xlu1 %70 }
  0x8b   :  { %v66_v31 = vpop.permute.xlu0 %65 }
  0x8e   :  { %v228_v17 = vpop.permute.xlu1 %227 }
  0x8f   :  { %v76_v41 = vpop.permute.xlu0 %75 }
  0x92   :  { %v238_v19 = vpop.permute.xlu1 %237 }
  0x93   :  { %v233_v18 = vpop.permute.xlu0 %232 }
  0x97   :  { %v243_v23 = vpop.permute.xlu0 %242 }
  0xdc   :  { %v447_v27 = vpop.f32.mrb[0].mxu0 }
  0xdd   :  { %v164_v29 = vadd.f32 %v447_v27, %v56_v25  ;;  %v155_v30 = vpop.f32.mrb[1].mxu0 }
  0xde   :  { %v156_v32 = vadd.f32 %v155_v30, %v46_v24  ;;  %v448_v33 = vpop.f32.mrb[2].mxu0 }
  0xdf   :  { %v187_v34 = vmul.f32 0.5, %v164_v29  ;;  %v167_v35 = vadd.f32 %v448_v33, %v61_v28  ;;  %v158_v36 = vpop.f32.mrb[3].mxu0 }
  0xe0   :  { %v185_v37 = vmul.f32 0.5, %v156_v32  ;;  %v159_v38 = vadd.f32 %v158_v36, %v51_v26 }
  0xe1   :  { %488 = vtanh.f32 %v187_v34  ;;  %v188_v39 = vmul.f32 0.5, %v167_v35 }
  0xe2   :  { %490 = vtanh.f32 %v185_v37  ;;  %v186_v40 = vmul.f32 0.5, %v159_v38 }
  0xe3   :  { %492 = vtanh.f32 %v188_v39 }
  0xe4   :  { %494 = vtanh.f32 %v186_v40  ;;  %v451_v42 = vpop.f32.mrb[4].mxu0 }
  0xe5   :  { %v180_v43 = vadd.f32 %v451_v42, %v76_v41  ;;  %v171_v44 = vpop.f32.mrb[5].mxu0 }
  0xe6   :  { %v172_v45 = vadd.f32 %v171_v44, %v66_v31  ;;  %v452_v46 = vpop.f32.mrb[6].mxu0 }
  0xe7   :  { %v191_v48 = vmul.f32 0.5, %v180_v43  ;;  %v174_v49 = vpop.f32.mrb[7].mxu0 }
  0xe8   :  { %v189_v50 = vmul.f32 0.5, %v172_v45  ;;  %v175_v51 = vadd.f32 %v174_v49, %v71_v47  ;;  %v340_v49 = vpop.permute.xlu1 %339 }
  0xe9   :  { %496 = vtanh.f32 %v191_v48  ;;  %v487_v48 = vld [vmem:[%s641_s5] sm:$0xff]  }
  0xea   :  { %498 = vtanh.f32 %v189_v50  ;;  %v190_v52 = vmul.f32 0.5, %v175_v51 }
  0xeb   :  { %v489_v53 = vpop.eup %488 }
  0xec   :  { %v491_v54 = vpop.eup %490  ;;  %v201_v55 = vadd.f32 1.0, %v489_v53  ;;  %500 = vtanh.f32 %v190_v52  ;;  %v345_v53 = vpop.permute.xlu0 %344 }
  0xed   :  { %v493_v56 = vpop.eup %492  ;;  %v199_v57 = vadd.f32 1.0, %v491_v54 }
  0xee   :  { %v495_v58 = vpop.eup %494  ;;  %v202_v59 = vadd.f32 1.0, %v493_v56  ;;  %v208_v61 = vmul.f32 0.5, %v201_v55 }
  0xef   :  { %v200_v60 = vadd.f32 1.0, %v495_v58  ;;  %v206_v63 = vmul.f32 0.5, %v199_v57 }
  0xf0   :  { %v209_v62 = vmul.f32 0.5, %v202_v59 }
  0xf1   :  { %v207_v0 = vmul.f32 0.5, %v200_v60 }
  0xf2   :  { %v218_v1 = vpack.c.bf16 %v209_v62, %v208_v61 }
  0xf3   :  { %v497_v2 = vpop.eup %496  ;;  %v217_v3 = vpack.c.bf16 %v207_v0, %v206_v63 }
  0xf4   :  { %v499_v4 = vpop.eup %498  ;;  %v205_v5 = vadd.f32 1.0, %v497_v2 }
  0xf5   :  { %v203_v6 = vadd.f32 1.0, %v499_v4  ;;  %453 = vmatprep.subr.bf16.mxu1 %v217_v3 }
  0xf6   :  { %v501_v7 = vpop.eup %500  ;;  %454 = vmatpush3.bf16.msra.mxu1 %v217_v3  ;;  %v212_v9 = vmul.f32 0.5, %v205_v5 }
  0xf7   :  { %v204_v8 = vadd.f32 1.0, %v501_v7  ;;  %455 = vmatprep.subr.bf16.mxu1 %v218_v1  ;;  %v210_v10 = vmul.f32 0.5, %v203_v6 }
  0xf8   :  { %v220_v13 = vpack.c.bf16 %v212_v9, %v212_v9 }
  0xf9   :  { %v211_v11 = vmul.f32 0.5, %v204_v8 }
  0xfa   :  { %456 = vmatpush3.bf16.msra.mxu1 %v218_v1  ;;  %v264_v14 = vsel %vm262_vm4, %v220_v13, 0 }
  0xfb   :  { %v219_v12 = vpack.c.bf16 %v211_v11, %v210_v10 }
  0xfd   :  { %457 = vmatprep.subr.bf16.mxu1 %v219_v12 }
  0xfe   :  { %458 = vmatpush3.bf16.msra.mxu1 %v219_v12 }
  0xff   :  { %473 = vmatprep.subr.msk.bf16.mxu1 %vm262_vm4, %v220_v13 }
 0x102   :  { %460 = vmatpush3.bf16.msra.mxu1 %v264_v14 }
 0x105   :  { %462 = vmatmul.mubr.msk.bf16.vlgmr.msra.gmra.mrb[0].mxu1 %vm255_vm3, %v486_v15 }
 0x1d8   :  { %v463_v20 = vpop.f32.mrb[0].mxu1 }
 0x1d9   :  { %v309_v21 = vadd.f32 %v463_v20, %v238_v19  ;;  %v300_v22 = vpop.f32.mrb[1].mxu1 }
 0x1da   :  { %v301_v24 = vadd.f32 %v300_v22, %v228_v17  ;;  %v464_v25 = vpop.f32.mrb[2].mxu1 }
 0x1db   :  { %v317_v26 = vmul.f32 0.5, %v309_v21  ;;  %v312_v27 = vadd.f32 %v464_v25, %v243_v23  ;;  %v303_v28 = vpop.f32.mrb[3].mxu1 }
 0x1dc   :  { %v315_v29 = vmul.f32 0.5, %v301_v24  ;;  %v304_v30 = vadd.f32 %v303_v28, %v233_v18 }
 0x1dd   :  { %502 = vtanh.f32 %v317_v26  ;;  %v318_v31 = vmul.f32 0.5, %v312_v27 }
 0x1de   :  { %504 = vtanh.f32 %v315_v29  ;;  %v316_v32 = vmul.f32 0.5, %v304_v30 }
 0x1df   :  { %506 = vtanh.f32 %v318_v31 }
 0x1e0   :  { %508 = vtanh.f32 %v316_v32 }
 0x1e7   :  { %v503_v33 = vpop.eup %502 }
 0x1e8   :  { %v505_v34 = vpop.eup %504  ;;  %v325_v35 = vadd.f32 1.0, %v503_v33 }
 0x1e9   :  { %v507_v36 = vpop.eup %506  ;;  %v323_v37 = vadd.f32 1.0, %v505_v34 }
 0x1ea   :  { %v509_v38 = vpop.eup %508  ;;  %v326_v39 = vadd.f32 1.0, %v507_v36  ;;  %v329_v41 = vmul.f32 0.5, %v325_v35 }
 0x1eb   :  { %v324_v40 = vadd.f32 1.0, %v509_v38  ;;  %v327_v43 = vmul.f32 0.5, %v323_v37 }
 0x1ec   :  { %v330_v42 = vmul.f32 0.5, %v326_v39 }
 0x1ed   :  { %v328_v44 = vmul.f32 0.5, %v324_v40 }
 0x1ee   :  { %v334_v45 = vpack.c.bf16 %v330_v42, %v329_v41 }
 0x1ef   :  { %v333_v46 = vpack.c.bf16 %v328_v44, %v327_v43 }
 0x1f0   :  { %v357_v47 = vsel %vm115_vm1, %v334_v45, 0 }
 0x1f1   :  { %466 = vmatpush3.bf16.msra.mxu0 %v333_v46 }
 0x1f2   :  { %467 = vmatprep.subr.bf16.mxu0 %v516_v16 }
 0x1f5   :  { %468 = vmatpush3.bf16.msra.mxu0 %v357_v47 }
 0x1f8   :  { %470 = vmatmul.mubr.msk.bf16.vlgmr.msra.gmra.mrb[8].mxu0 %vm352_vm6, %v487_v48 }
 0x2cb   :  { %v393_v50 = vpop.f32.mrb[8].mxu0 }
 0x2cc   :  { %v394_v51 = vadd.f32 %v393_v50, %v340_v49  ;;  %v471_v52 = vpop.f32.mrb[9].mxu0 }
 0x2cd   :  { %v396_v54 = vpop.f32.mrb[10].mxu0 }
 0x2ce   :  { %v400_v55 = vmul.f32 0.5, %v394_v51  ;;  %v397_v56 = vadd.f32 %v396_v54, %v345_v53  ;;  %v472_v57 = vpop.f32.mrb[11].mxu0 }
 0x2d0   :  { %510 = vtanh.f32 %v400_v55  ;;  %v401_v58 = vmul.f32 0.5, %v397_v56 }
 0x2d2   :  { %512 = vtanh.f32 %v401_v58 }
 0x2da   :  { %v511_v59 = vpop.eup %510 }
 0x2db   :  { %v404_v60 = vadd.f32 1.0, %v511_v59 }
 0x2dc   :  { %v513_v61 = vpop.eup %512 }
 0x2dd   :  { %v406_v62 = vmul.f32 0.5, %v404_v60  ;;  %v405_v63 = vadd.f32 1.0, %v513_v61 }
 0x2df   :  { %408 = vst [vmem:[%s642_s7] sm:$0xff] %v406_v62  ;;  %v407_v0 = vmul.f32 0.5, %v405_v63 }
 0x2e1   :  { %409 = vst [vmem:[%s642_s7 + $0x8] sm:$0x7f] %v407_v0 }

</bundles_post_ra>
